<compile_context>
chip_gen: v7x
topology: tpu7x:2x2x1
jax: 0.10.0
libtpu: 0.0.40
codegen_flags: <defaults>
</compile_context>

<pallas_src>
import functools

import jax
import jax.numpy as jnp
from jax import lax
from jax.experimental import pallas as pl
from jax.experimental.pallas import tpu as pltpu


# ----------------------------------------------------------------------------
# Host-side parameter packing: many tiny arrays -> one (rows, 128) slab.
# ----------------------------------------------------------------------------
def _pack_slab(entries, dtype, row_align):
  """Pack [(name, 2D array)] into a (rows, 128) slab; returns (slab, offsets).

  Each entry occupies rows [off, off+r) and lanes [0, c); row offsets are
  aligned to `row_align` (the sublane tile: 8 for f32, 16 for bf16) so the
  in-kernel static slices start on tile boundaries.
  """
  offsets = {}
  blocks = []
  row = 0
  for name, arr in entries:
    arr = jnp.asarray(arr, dtype)
    r, c = arr.shape
    assert c <= 128, f"{name}: width {c} > 128 lanes"
    pr = ((r + row_align - 1) // row_align) * row_align
    blk = jnp.zeros((pr, 128), dtype).at[:r, :c].set(arr)
    blocks.append(blk)
    offsets[name] = (row, r, c)
    row += pr
  return jnp.concatenate(blocks, axis=0), offsets


# ----------------------------------------------------------------------------
# Fused forward kernel (one grid step == one graph)
# ----------------------------------------------------------------------------
def _fused_forward_kernel(h_ref, adj_ref, wslab_ref, fslab_ref, out_ref,
                          h1_scratch, *, num_heads, out_feats, w_off, f_off):
  f32 = jnp.float32
  bf16 = jnp.bfloat16
  neg = jnp.float32(-1e30)
  hd = out_feats
  n = out_ref.shape[0]

  def take_w(name):  # bf16 slab (matmul operands)
    o, r, c = w_off[name]
    return wslab_ref[pl.ds(o, r), pl.ds(0, c)]

  def take_f(name):  # f32 slab (biases, attn_r, v1_proj)
    o, r, c = f_off[name]
    return fslab_ref[pl.ds(o, r), pl.ds(0, c)]

  # Adjacency mask (adj shipped as bf16; {0,1} is exact).
  mask = adj_ref[...].astype(f32) > 0.0

  # Input projection: Linear(3*emb_dim -> emb_dim).  bf16 MXU, f32 accumulate.
  h = jnp.dot(h_ref[...], take_w("inproj_w_t"),
              preferred_element_type=f32) + take_f("inproj_b")

  def gat_layer(x_f32, w_name, al_name, ar_name, b_name, nheads, scratch):
    # Dense DGL GATConv (eval mode):
    #   z        = x @ W^T  (viewed as (N, heads, out_feats))
    #   e_{u->v} = LeakyReLU_{0.2}( <z_u, attn_l> + <z_v, attn_r> )
    #   alpha    = softmax over incoming edges of v
    #   out_v    = sum_u alpha_{vu} * z_u + bias
    z = jnp.dot(x_f32.astype(bf16), take_w(w_name), preferred_element_type=f32)
    al_all = take_w(al_name)                       # (nheads, hd) bf16  (MXU el)
    ar_all = take_f(ar_name)                       # (nheads, hd) f32   (VPU er)
    single = None
    for hh in range(nheads):
      zh = z[:, hh * hd:(hh + 1) * hd]             # (N, hd) f32
      zh_bf = zh.astype(bf16)
      al = al_all[hh:hh + 1, :]                    # (1, hd) bf16
      ar = ar_all[hh:hh + 1, :]                    # (1, hd) f32
      # per-source term: lane-dense (1, N) row directly off the MXU
      el = lax.dot_general(al, zh_bf, (((1,), (1,)), ((), ())),
                           preferred_element_type=f32)
      # per-destination term on the VPU (avoids a 1-lane-wide MXU result)
      er = jnp.sum(zh * ar, axis=-1, keepdims=True)            # (N, 1)
      e = er + el                                               # (N, N): e[dst, src]
      # Fused LeakyReLU(0.2) + adjacency masking.
      e = jnp.where(mask, jnp.where(e > 0.0, e, 0.2 * e), neg)
      m = jnp.max(e, axis=-1, keepdims=True)
      # masked entries sit at -1e30, so exp underflows to exactly 0;
      # self-loops (required, DGL errors on zero in-degree) keep m finite.
      p = jnp.exp(e - m)
      s = jnp.sum(p, axis=-1, keepdims=True)
      inv = pl.reciprocal(jnp.maximum(s, 1e-30), approx=True)   # EUP, NaN-guarded
      alpha = (p * inv).astype(bf16)                            # attn_drop: eval no-op
      ho = jnp.dot(alpha, zh_bf, preferred_element_type=f32)    # (N, hd)
      if nheads == 1:
        single = ho
      else:
        scratch[:, hh * hd:(hh + 1) * hd] = ho                  # static lane offset
    out = single if nheads == 1 else scratch[...]
    return out + take_f(b_name)

  h1 = gat_layer(h, "gat1_wfc_t", "gat1_al", "gat1_ar", "gat1_b",
                 num_heads, h1_scratch)                         # (N, NH*hd)
  h2 = gat_layer(h1, "gat2_wfc_t", "gat2_al", "gat2_ar", "gat2_b", 1, None)
  h2_bf = h2.astype(bf16)

  # attention scores vs projected v1 (g.ndata['att_score']) -- VPU reduce
  att = jnp.sum(h2 * take_f("v1_proj"), axis=-1, keepdims=True)  # (N, 1)

  # node head: Linear -> ReLU -> (Dropout no-op) -> Linear
  t = jnp.dot(h2_bf, take_w("node_w1_t"),
              preferred_element_type=f32) + take_f("node_b1")
  t = jnp.maximum(t, 0.0).astype(bf16)
  node_logits = jnp.dot(t, take_w("node_w2_t"),
                        preferred_element_type=f32) + take_f("node_b2")

  # graph head: mean_nodes -> Linear -> ReLU -> Linear
  hg = jnp.mean(h2, axis=0, keepdims=True).astype(bf16)          # (1, hd)
  tg = jnp.dot(hg, take_w("graph_w1_t"),
               preferred_element_type=f32) + take_f("graph_b1")
  tg = jnp.maximum(tg, 0.0).astype(bf16)
  graph_logits = jnp.dot(tg, take_w("graph_w2_t"),
                         preferred_element_type=f32) + take_f("graph_b2")

  # Single lane-dense store: [node(2) | att(1) | graph(2, broadcast) | zero pad]
  out_ref[...] = jnp.concatenate(
      [node_logits, att, jnp.broadcast_to(graph_logits, (n, 2)),
       jnp.zeros((n, 128 - 5), f32)], axis=-1)


def fused_forward(h_in, adj, wslab, fslab, w_off, f_off, *, num_heads,
                  hidden_feats):
  b, n, fin = h_in.shape
  hd, nh = hidden_feats, num_heads
  emb_dim = w_off["inproj_w_t"][2]

  kern = functools.partial(_fused_forward_kernel, num_heads=nh, out_feats=hd,
                           w_off=w_off, f_off=f_off)

  # Advisory cost: flops dominated by per-head (N,N)x(N,hd) aggregation,
  # transcendentals by the N^2 exp per head, bytes by adj + features.
  per_head = 4 * n * hd + 6 * n * n + 2 * n * n * hd
  flops = b * (2 * n * fin * emb_dim
               + 2 * n * emb_dim * nh * hd + nh * per_head
               + 2 * n * nh * hd * hd + per_head
               + 2 * n * hd * hd + 4 * n * hd
               + 2 * hd * hd + 4 * hd
               + 2 * n * hd)
  cost = pl.CostEstimate(
      flops=int(flops),
      transcendentals=int(b * (nh + 1) * n * n),
      bytes_accessed=int(h_in.size * 2 + adj.size * 2 + wslab.size * 2
                         + fslab.size * 4 + b * n * 128 * 4))

  return pl.pallas_call(
      kern,
      out_shape=jax.ShapeDtypeStruct((b, n, 128), jnp.float32),
      grid=(b,),
      in_specs=[
          pl.BlockSpec((None, n, fin), lambda i: (i, 0, 0)),     # per-graph feats
          pl.BlockSpec((None, n, n), lambda i: (i, 0, 0)),       # per-graph adj
          pl.BlockSpec(wslab.shape, lambda i: (0, 0)),           # bf16 param slab
          pl.BlockSpec(fslab.shape, lambda i: (0, 0)),           # f32 param slab
      ],
      out_specs=pl.BlockSpec((None, n, 128), lambda i: (i, 0, 0)),
      scratch_shapes=[pltpu.VMEM((n, num_heads * hidden_feats), jnp.float32)],
      compiler_params=pltpu.CompilerParams(
          dimension_semantics=("parallel",),
          vmem_limit_bytes=32 * 1024 * 1024),
      cost_estimate=cost,
  )(h_in, adj, wslab, fslab)


# ----------------------------------------------------------------------------
# Glue (plain JAX): interpolation, parameter init, orchestration
# ----------------------------------------------------------------------------
def nearest_interp_cols(x, out_size):
  """F.interpolate(x.unsqueeze(0), size=out_size, mode='nearest').squeeze(0)."""
  in_size = x.shape[-1]
  idx = (jnp.arange(out_size) * in_size) // out_size
  return x[..., idx]


def init_linear(key, din, dout):
  k1, k2 = jax.random.split(key)
  bound = 1.0 / (din ** 0.5)
  w = jax.random.uniform(k1, (dout, din), jnp.float32, -bound, bound)
  b = jax.random.uniform(k2, (dout,), jnp.float32, -bound, bound)
  return w, b


def init_params(key, in_feats, hidden_feats, num_heads, v1_len, emb_dim):
  keys = jax.random.split(key, 16)
  p = {}
  w, b = init_linear(keys[0], 3 * emb_dim, emb_dim)
  p["inproj_w_t"], p["inproj_b"] = w.T, b.reshape(1, -1)
  p["beta_w1"], p["beta_b1"] = init_linear(keys[1], v1_len, 16)
  p["beta_w2"], p["beta_b2"] = init_linear(keys[2], 16, 1)
  w, _ = init_linear(keys[3], in_feats, num_heads * hidden_feats)
  p["gat1_wfc_t"] = w.T
  p["gat1_al"] = jax.random.normal(keys[4], (num_heads, hidden_feats), jnp.float32) * 0.1
  p["gat1_ar"] = jax.random.normal(keys[5], (num_heads, hidden_feats), jnp.float32) * 0.1
  p["gat1_b"] = jnp.zeros((1, num_heads * hidden_feats), jnp.float32)
  w, _ = init_linear(keys[6], num_heads * hidden_feats, hidden_feats)
  p["gat2_wfc_t"] = w.T
  p["gat2_al"] = jax.random.normal(keys[7], (1, hidden_feats), jnp.float32) * 0.1
  p["gat2_ar"] = jax.random.normal(keys[8], (1, hidden_feats), jnp.float32) * 0.1
  p["gat2_b"] = jnp.zeros((1, hidden_feats), jnp.float32)
  w, b = init_linear(keys[9], hidden_feats, hidden_feats)
  p["node_w1_t"], p["node_b1"] = w.T, b.reshape(1, -1)
  w, b = init_linear(keys[10], hidden_feats, 2)
  p["node_w2_t"], p["node_b2"] = w.T, b.reshape(1, -1)
  w, b = init_linear(keys[11], hidden_feats, hidden_feats)
  p["graph_w1_t"], p["graph_b1"] = w.T, b.reshape(1, -1)
  w, b = init_linear(keys[12], hidden_feats, 2)
  p["graph_w2_t"], p["graph_b2"] = w.T, b.reshape(1, -1)
  p["v1proj_w"], p["v1proj_b"] = init_linear(keys[13], v1_len, hidden_feats)
  p["v1"] = jax.random.normal(keys[14], (v1_len,), jnp.float32)
  return p


def multitask_gat_forward(params, ndata, adj, *, hidden_feats, num_heads,
                          base_dropout=0.1, embedd_method="Codebert",
                          glmethod="attention"):
  """ndata fields are (B, N, d); adj is (B, N, N) with self-loops on every node."""
  rand_feat = ndata["_RANDFEAT"].astype(jnp.float32)
  func_emb = ndata["_FUNC_EMB"].astype(jnp.float32)
  if embedd_method == "Codebert":
    emb = ndata["_CODEBERT"].astype(jnp.float32)
  elif embedd_method == "Word2vec":
    emb = ndata["_WORD2VEC"].astype(jnp.float32)
  elif embedd_method == "Sbert":
    emb = ndata["_SBERT"].astype(jnp.float32)
  else:
    raise ValueError(f"Unsupported embedding method: {embedd_method}")

  emb_dim = emb.shape[-1]
  func_i = nearest_interp_cols(func_emb, emb_dim)
  rand_i = nearest_interp_cols(rand_feat, emb_dim)
  h_in = jnp.concatenate([rand_i, func_i, emb], axis=-1)        # (B, N, 3*emb_dim)
  bsz, n = h_in.shape[0], h_in.shape[1]

  # compute_beta(): beta_mlp(v1); only modulates dropout p (eval no-op).
  v1 = params["v1"]
  bh = jnp.maximum(v1 @ params["beta_w1"].T + params["beta_b1"], 0.0)
  beta = jax.nn.sigmoid(bh @ params["beta_w2"].T + params["beta_b2"])[0]
  dynamic_dropout = jnp.minimum(base_dropout * (1.0 + beta), 0.8)   # unused at eval

  v1_proj = (v1 @ params["v1proj_w"].T + params["v1proj_b"]).reshape(1, -1)  # (1, Hd)

  # Pack parameters: one bf16 slab (matmul operands), one f32 slab (biases,
  # attn_r vectors for the VPU path, v1_proj).
  wslab, w_off = _pack_slab(
      [("inproj_w_t", params["inproj_w_t"]),
       ("gat1_wfc_t", params["gat1_wfc_t"]),
       ("gat1_al", params["gat1_al"]),
       ("gat2_wfc_t", params["gat2_wfc_t"]),
       ("gat2_al", params["gat2_al"]),
       ("node_w1_t", params["node_w1_t"]),
       ("node_w2_t", params["node_w2_t"]),
       ("graph_w1_t", params["graph_w1_t"]),
       ("graph_w2_t", params["graph_w2_t"])],
      jnp.bfloat16, row_align=16)
  fslab, f_off = _pack_slab(
      [("inproj_b", params["inproj_b"]),
       ("gat1_ar", params["gat1_ar"]),
       ("gat1_b", params["gat1_b"]),
       ("gat2_ar", params["gat2_ar"]),
       ("gat2_b", params["gat2_b"]),
       ("node_b1", params["node_b1"]),
       ("node_b2", params["node_b2"]),
       ("graph_b1", params["graph_b1"]),
       ("graph_b2", params["graph_b2"]),
       ("v1_proj", v1_proj)],
      jnp.float32, row_align=8)

  out = fused_forward(h_in.astype(jnp.bfloat16), adj.astype(jnp.bfloat16),
                      wslab, fslab, w_off, f_off,
                      num_heads=num_heads, hidden_feats=hidden_feats)

  node_logits = out[:, :, 0:2]          # (B, N, 2)
  att = out[:, :, 2]                    # (B, N)   g.ndata['att_score']
  graph_logits = out[:, 0, 3:5]         # (B, 2)

  if glmethod == "attention":
    side = att
  elif glmethod == "dependency":
    side = jnp.broadcast_to(v1_proj.astype(jnp.float32)[None],
                            (bsz, n, v1_proj.shape[-1]))
  else:
    side = None
  return node_logits, graph_logits, dynamic_dropout, side


# ----------------------------------------------------------------------------
# Main
# ----------------------------------------------------------------------------
if __name__ == "__main__":
  key = jax.random.PRNGKey(0)
  B = 2                 # graphs per batch (grid axis)
  N = 8                 # nodes per graph
  emb_dim = 32          # in_feats (embedding width)
  hidden_feats = 16
  num_heads = 2
  v1_len = 4

  k_feat, k_param = jax.random.split(key)
  kr, kf, ke = jax.random.split(k_feat, 3)
  ndata = {
      "_RANDFEAT": jax.random.normal(kr, (B, N, 12), jnp.float32),
      "_FUNC_EMB": jax.random.normal(kf, (B, N, 20), jnp.float32),
      "_CODEBERT": jax.random.normal(ke, (B, N, emb_dim), jnp.float32),
  }

  # Per-graph directed ring graphs with self-loops; adj[b, dst, src] = 1.
  # Self-loops are mandatory (DGL GATConv raises on zero in-degree; they also
  # keep the in-kernel softmax row max finite).
  eye = jnp.eye(N, dtype=jnp.float32)
  src = jnp.arange(N)
  dst = (src + 1) % N
  adj0 = eye.at[dst, src].set(1.0)      # forward ring
  adj1 = eye.at[src, dst].set(1.0)      # reverse ring
  adj = jnp.stack([adj0, adj1], axis=0)

  params = init_params(k_param, emb_dim, hidden_feats, num_heads, v1_len, emb_dim)

  node_logits, graph_logits, dyn_p, side = multitask_gat_forward(
      params, ndata, adj, hidden_feats=hidden_feats, num_heads=num_heads,
      base_dropout=0.1, embedd_method="Codebert", glmethod="attention")

  jax.block_until_ready((node_logits, graph_logits, dyn_p, side))
  assert node_logits.shape == (B, N, 2)
  assert graph_logits.shape == (B, 2)
  assert side.shape == (B, N)
  print("KERNEL_OK")
</pallas_src>

<mosaic_0001>
module attributes {stable_mosaic.version = 11 : i64} {
  func.func @_fused_forward_kernel(%arg0: i32, %arg1: memref<1x8x96xbf16, #tpu.memory_space<vmem>>, %arg2: memref<1x8x8xbf16, #tpu.memory_space<vmem>>, %arg3: memref<256x128xbf16, #tpu.memory_space<vmem>>, %arg4: memref<80x128xf32, #tpu.memory_space<vmem>>, %arg5: memref<1x8x128xf32, #tpu.memory_space<vmem>>, %arg6: memref<8x32xf32, #tpu.memory_space<vmem>>) attributes {dimension_semantics = [#tpu.dimension_semantics<parallel>], iteration_bounds = array<i64: 2>, scalar_prefetch = 0 : i64, scratch_operands = 1 : i64, tpu.core_type = #tpu.core_type<tc>, window_params = [{transform_indices = @transform_0, window_bounds = array<i64: 1, 8, 96>}, {transform_indices = @transform_1, window_bounds = array<i64: 1, 8, 8>}, {pipeline_mode = #tpu.pipeline_mode<synchronous>, transform_indices = @transform_2, window_bounds = array<i64: 256, 128>}, {pipeline_mode = #tpu.pipeline_mode<synchronous>, transform_indices = @transform_3, window_bounds = array<i64: 80, 128>}, {transform_indices = @transform_4, window_bounds = array<i64: 1, 8, 128>}]} {
    %c0 = arith.constant 0 : index
    %c0_0 = arith.constant 0 : index
    %c0_1 = arith.constant 0 : index
    %0 = vector.load %arg2[%c0, %c0_0, %c0_1] : memref<1x8x8xbf16, #tpu.memory_space<vmem>>, vector<1x8x8xbf16>
    %1 = vector.shape_cast %0 : vector<1x8x8xbf16> to vector<8x8xbf16>
    %2 = arith.extf %1 : vector<8x8xbf16> to vector<8x8xf32>
    %cst = arith.constant 0.000000e+00 : f32
    %3 = vector.broadcast %cst : f32 to vector<8x8xf32>
    %4 = arith.cmpf ogt, %2, %3 : vector<8x8xf32>
    %c0_2 = arith.constant 0 : index
    %c0_3 = arith.constant 0 : index
    %c0_4 = arith.constant 0 : index
    %5 = vector.load %arg1[%c0_2, %c0_3, %c0_4] : memref<1x8x96xbf16, #tpu.memory_space<vmem>>, vector<1x8x96xbf16>
    %6 = vector.shape_cast %5 : vector<1x8x96xbf16> to vector<8x96xbf16>
    %c0_5 = arith.constant 0 : index
    %c0_6 = arith.constant 0 : index
    %7 = vector.load %arg3[%c0_5, %c0_6] : memref<256x128xbf16, #tpu.memory_space<vmem>>, vector<96x32xbf16>
    %cst_7 = arith.constant dense<0.000000e+00> : vector<8x32xf32>
    %8 = tpu.matmul %6, %7, %cst_7 {dimension_numbers = #tpu.dot_dimension_numbers<[1], [0], [0], [1], [0, 0, 1, 1], [], []>} : vector<8x96xbf16>, vector<96x32xbf16>, vector<8x32xf32> -> vector<8x32xf32>
    %c0_8 = arith.constant 0 : index
    %c0_9 = arith.constant 0 : index
    %9 = vector.load %arg4[%c0_8, %c0_9] : memref<80x128xf32, #tpu.memory_space<vmem>>, vector<1x32xf32>
    %10 = vector.broadcast %9 : vector<1x32xf32> to vector<8x32xf32>
    %11 = arith.addf %8, %10 : vector<8x32xf32>
    %12 = arith.truncf %11 : vector<8x32xf32> to vector<8x32xbf16>
    %c96 = arith.constant 96 : index
    %c0_10 = arith.constant 0 : index
    %13 = vector.load %arg3[%c96, %c0_10] : memref<256x128xbf16, #tpu.memory_space<vmem>>, vector<32x32xbf16>
    %cst_11 = arith.constant dense<0.000000e+00> : vector<8x32xf32>
    %14 = tpu.matmul %12, %13, %cst_11 {dimension_numbers = #tpu.dot_dimension_numbers<[1], [0], [0], [1], [0, 0, 1, 1], [], []>} : vector<8x32xbf16>, vector<32x32xbf16>, vector<8x32xf32> -> vector<8x32xf32>
    %c128 = arith.constant 128 : index
    %c0_12 = arith.constant 0 : index
    %15 = vector.load %arg3[%c128, %c0_12] : memref<256x128xbf16, #tpu.memory_space<vmem>>, vector<2x16xbf16>
    %c8 = arith.constant 8 : index
    %c0_13 = arith.constant 0 : index
    %16 = vector.load %arg4[%c8, %c0_13] : memref<80x128xf32, #tpu.memory_space<vmem>>, vector<2x16xf32>
    %17 = vector.extract_strided_slice %14 {offsets = [0, 0], sizes = [8, 16], strides = [1, 1]} : vector<8x32xf32> to vector<8x16xf32>
    %18 = arith.truncf %17 : vector<8x16xf32> to vector<8x16xbf16>
    %19 = vector.extract_strided_slice %15 {offsets = [0, 0], sizes = [1, 16], strides = [1, 1]} : vector<2x16xbf16> to vector<1x16xbf16>
    %20 = vector.extract_strided_slice %16 {offsets = [0, 0], sizes = [1, 16], strides = [1, 1]} : vector<2x16xf32> to vector<1x16xf32>
    %cst_14 = arith.constant dense<0.000000e+00> : vector<1x8xf32>
    %21 = tpu.matmul %19, %18, %cst_14 {dimension_numbers = #tpu.dot_dimension_numbers<[1], [1], [0], [0], [0, 0, 1, 0], [], []>} : vector<1x16xbf16>, vector<8x16xbf16>, vector<1x8xf32> -> vector<1x8xf32>
    %22 = vector.broadcast %20 : vector<1x16xf32> to vector<8x16xf32>
    %23 = arith.mulf %17, %22 : vector<8x16xf32>
    %cst_15 = arith.constant dense<0.000000e+00> : vector<8xf32>
    %24 = vector.multi_reduction <add>, %23, %cst_15 [1] : vector<8x16xf32> to vector<8xf32>
    %25 = vector.shape_cast %24 : vector<8xf32> to vector<8x1xf32>
    %26 = vector.broadcast %25 : vector<8x1xf32> to vector<8x8xf32>
    %27 = vector.broadcast %21 : vector<1x8xf32> to vector<8x8xf32>
    %28 = arith.addf %26, %27 : vector<8x8xf32>
    %cst_16 = arith.constant 0.000000e+00 : f32
    %29 = vector.broadcast %cst_16 : f32 to vector<8x8xf32>
    %30 = arith.cmpf ogt, %28, %29 : vector<8x8xf32>
    %cst_17 = arith.constant 2.000000e-01 : f32
    %31 = vector.broadcast %cst_17 : f32 to vector<8x8xf32>
    %32 = arith.mulf %31, %28 : vector<8x8xf32>
    %33 = arith.select %30, %28, %32 : vector<8x8xi1>, vector<8x8xf32>
    %cst_18 = arith.constant -1.000000e+30 : f32
    %34 = vector.broadcast %cst_18 : f32 to vector<8x8xf32>
    %35 = arith.select %4, %33, %34 : vector<8x8xi1>, vector<8x8xf32>
    %cst_19 = arith.constant dense<0xFF800000> : vector<8xf32>
    %36 = vector.multi_reduction <maximumf>, %35, %cst_19 [1] : vector<8x8xf32> to vector<8xf32>
    %37 = vector.shape_cast %36 : vector<8xf32> to vector<8x1xf32>
    %38 = vector.broadcast %37 : vector<8x1xf32> to vector<8x8xf32>
    %39 = arith.subf %35, %38 : vector<8x8xf32>
    %40 = math.exp %39 : vector<8x8xf32>
    %cst_20 = arith.constant dense<0.000000e+00> : vector<8xf32>
    %41 = vector.multi_reduction <add>, %40, %cst_20 [1] : vector<8x8xf32> to vector<8xf32>
    %42 = vector.shape_cast %41 : vector<8xf32> to vector<8x1xf32>
    %cst_21 = arith.constant 1.000000e-30 : f32
    %43 = vector.broadcast %cst_21 : f32 to vector<8x1xf32>
    %44 = arith.maximumf %42, %43 : vector<8x1xf32>
    %45 = tpu.reciprocal %44 {approx = true} : vector<8x1xf32> -> vector<8x1xf32>
    %46 = vector.broadcast %45 : vector<8x1xf32> to vector<8x8xf32>
    %47 = arith.mulf %40, %46 : vector<8x8xf32>
    %48 = arith.truncf %47 : vector<8x8xf32> to vector<8x8xbf16>
    %cst_22 = arith.constant dense<0.000000e+00> : vector<8x16xf32>
    %49 = tpu.matmul %48, %18, %cst_22 {dimension_numbers = #tpu.dot_dimension_numbers<[1], [0], [0], [1], [0, 0, 1, 1], [], []>} : vector<8x8xbf16>, vector<8x16xbf16>, vector<8x16xf32> -> vector<8x16xf32>
    %c0_23 = arith.constant 0 : index
    %c0_24 = arith.constant 0 : index
    %50 = vector.load %arg6[%c0_23, %c0_24] : memref<8x32xf32, #tpu.memory_space<vmem>>, vector<8x16xf32>
    tpu.vector_store %arg6[%c0_23, %c0_24], %49 {strides = array<i32>} : memref<8x32xf32, #tpu.memory_space<vmem>>, vector<8x16xf32>,
    %51 = vector.extract_strided_slice %14 {offsets = [0, 16], sizes = [8, 16], strides = [1, 1]} : vector<8x32xf32> to vector<8x16xf32>
    %52 = arith.truncf %51 : vector<8x16xf32> to vector<8x16xbf16>
    %53 = vector.extract_strided_slice %15 {offsets = [1, 0], sizes = [1, 16], strides = [1, 1]} : vector<2x16xbf16> to vector<1x16xbf16>
    %54 = vector.extract_strided_slice %16 {offsets = [1, 0], sizes = [1, 16], strides = [1, 1]} : vector<2x16xf32> to vector<1x16xf32>
    %cst_25 = arith.constant dense<0.000000e+00> : vector<1x8xf32>
    %55 = tpu.matmul %53, %52, %cst_25 {dimension_numbers = #tpu.dot_dimension_numbers<[1], [1], [0], [0], [0, 0, 1, 0], [], []>} : vector<1x16xbf16>, vector<8x16xbf16>, vector<1x8xf32> -> vector<1x8xf32>
    %56 = vector.broadcast %54 : vector<1x16xf32> to vector<8x16xf32>
    %57 = arith.mulf %51, %56 : vector<8x16xf32>
    %cst_26 = arith.constant dense<0.000000e+00> : vector<8xf32>
    %58 = vector.multi_reduction <add>, %57, %cst_26 [1] : vector<8x16xf32> to vector<8xf32>
    %59 = vector.shape_cast %58 : vector<8xf32> to vector<8x1xf32>
    %60 = vector.broadcast %59 : vector<8x1xf32> to vector<8x8xf32>
    %61 = vector.broadcast %55 : vector<1x8xf32> to vector<8x8xf32>
    %62 = arith.addf %60, %61 : vector<8x8xf32>
    %cst_27 = arith.constant 0.000000e+00 : f32
    %63 = vector.broadcast %cst_27 : f32 to vector<8x8xf32>
    %64 = arith.cmpf ogt, %62, %63 : vector<8x8xf32>
    %cst_28 = arith.constant 2.000000e-01 : f32
    %65 = vector.broadcast %cst_28 : f32 to vector<8x8xf32>
    %66 = arith.mulf %65, %62 : vector<8x8xf32>
    %67 = arith.select %64, %62, %66 : vector<8x8xi1>, vector<8x8xf32>
    %cst_29 = arith.constant -1.000000e+30 : f32
    %68 = vector.broadcast %cst_29 : f32 to vector<8x8xf32>
    %69 = arith.select %4, %67, %68 : vector<8x8xi1>, vector<8x8xf32>
    %cst_30 = arith.constant dense<0xFF800000> : vector<8xf32>
    %70 = vector.multi_reduction <maximumf>, %69, %cst_30 [1] : vector<8x8xf32> to vector<8xf32>
    %71 = vector.shape_cast %70 : vector<8xf32> to vector<8x1xf32>
    %72 = vector.broadcast %71 : vector<8x1xf32> to vector<8x8xf32>
    %73 = arith.subf %69, %72 : vector<8x8xf32>
    %74 = math.exp %73 : vector<8x8xf32>
    %cst_31 = arith.constant dense<0.000000e+00> : vector<8xf32>
    %75 = vector.multi_reduction <add>, %74, %cst_31 [1] : vector<8x8xf32> to vector<8xf32>
    %76 = vector.shape_cast %75 : vector<8xf32> to vector<8x1xf32>
    %cst_32 = arith.constant 1.000000e-30 : f32
    %77 = vector.broadcast %cst_32 : f32 to vector<8x1xf32>
    %78 = arith.maximumf %76, %77 : vector<8x1xf32>
    %79 = tpu.reciprocal %78 {approx = true} : vector<8x1xf32> -> vector<8x1xf32>
    %80 = vector.broadcast %79 : vector<8x1xf32> to vector<8x8xf32>
    %81 = arith.mulf %74, %80 : vector<8x8xf32>
    %82 = arith.truncf %81 : vector<8x8xf32> to vector<8x8xbf16>
    %cst_33 = arith.constant dense<0.000000e+00> : vector<8x16xf32>
    %83 = tpu.matmul %82, %52, %cst_33 {dimension_numbers = #tpu.dot_dimension_numbers<[1], [0], [0], [1], [0, 0, 1, 1], [], []>} : vector<8x8xbf16>, vector<8x16xbf16>, vector<8x16xf32> -> vector<8x16xf32>
    %c0_34 = arith.constant 0 : index
    %c16 = arith.constant 16 : index
    %84 = vector.load %arg6[%c0_34, %c16] : memref<8x32xf32, #tpu.memory_space<vmem>>, vector<8x16xf32>
    tpu.vector_store %arg6[%c0_34, %c16], %83 {strides = array<i32>} : memref<8x32xf32, #tpu.memory_space<vmem>>, vector<8x16xf32>,
    %c0_35 = arith.constant 0 : index
    %c0_36 = arith.constant 0 : index
    %85 = vector.load %arg6[%c0_35, %c0_36] : memref<8x32xf32, #tpu.memory_space<vmem>>, vector<8x32xf32>
    %c16_37 = arith.constant 16 : index
    %c0_38 = arith.constant 0 : index
    %86 = vector.load %arg4[%c16_37, %c0_38] : memref<80x128xf32, #tpu.memory_space<vmem>>, vector<1x32xf32>
    %87 = vector.broadcast %86 : vector<1x32xf32> to vector<8x32xf32>
    %88 = arith.addf %85, %87 : vector<8x32xf32>
    %89 = arith.truncf %88 : vector<8x32xf32> to vector<8x32xbf16>
    %c144 = arith.constant 144 : index
    %c0_39 = arith.constant 0 : index
    %90 = vector.load %arg3[%c144, %c0_39] : memref<256x128xbf16, #tpu.memory_space<vmem>>, vector<32x16xbf16>
    %cst_40 = arith.constant dense<0.000000e+00> : vector<8x16xf32>
    %91 = tpu.matmul %89, %90, %cst_40 {dimension_numbers = #tpu.dot_dimension_numbers<[1], [0], [0], [1], [0, 0, 1, 1], [], []>} : vector<8x32xbf16>, vector<32x16xbf16>, vector<8x16xf32> -> vector<8x16xf32>
    %c176 = arith.constant 176 : index
    %c0_41 = arith.constant 0 : index
    %92 = vector.load %arg3[%c176, %c0_41] : memref<256x128xbf16, #tpu.memory_space<vmem>>, vector<1x16xbf16>
    %c24 = arith.constant 24 : index
    %c0_42 = arith.constant 0 : index
    %93 = vector.load %arg4[%c24, %c0_42] : memref<80x128xf32, #tpu.memory_space<vmem>>, vector<1x16xf32>
    %94 = arith.truncf %91 : vector<8x16xf32> to vector<8x16xbf16>
    %cst_43 = arith.constant dense<0.000000e+00> : vector<1x8xf32>
    %95 = tpu.matmul %92, %94, %cst_43 {dimension_numbers = #tpu.dot_dimension_numbers<[1], [1], [0], [0], [0, 0, 1, 0], [], []>} : vector<1x16xbf16>, vector<8x16xbf16>, vector<1x8xf32> -> vector<1x8xf32>
    %96 = vector.broadcast %93 : vector<1x16xf32> to vector<8x16xf32>
    %97 = arith.mulf %91, %96 : vector<8x16xf32>
    %cst_44 = arith.constant dense<0.000000e+00> : vector<8xf32>
    %98 = vector.multi_reduction <add>, %97, %cst_44 [1] : vector<8x16xf32> to vector<8xf32>
    %99 = vector.shape_cast %98 : vector<8xf32> to vector<8x1xf32>
    %100 = vector.broadcast %99 : vector<8x1xf32> to vector<8x8xf32>
    %101 = vector.broadcast %95 : vector<1x8xf32> to vector<8x8xf32>
    %102 = arith.addf %100, %101 : vector<8x8xf32>
    %cst_45 = arith.constant 0.000000e+00 : f32
    %103 = vector.broadcast %cst_45 : f32 to vector<8x8xf32>
    %104 = arith.cmpf ogt, %102, %103 : vector<8x8xf32>
    %cst_46 = arith.constant 2.000000e-01 : f32
    %105 = vector.broadcast %cst_46 : f32 to vector<8x8xf32>
    %106 = arith.mulf %105, %102 : vector<8x8xf32>
    %107 = arith.select %104, %102, %106 : vector<8x8xi1>, vector<8x8xf32>
    %cst_47 = arith.constant -1.000000e+30 : f32
    %108 = vector.broadcast %cst_47 : f32 to vector<8x8xf32>
    %109 = arith.select %4, %107, %108 : vector<8x8xi1>, vector<8x8xf32>
    %cst_48 = arith.constant dense<0xFF800000> : vector<8xf32>
    %110 = vector.multi_reduction <maximumf>, %109, %cst_48 [1] : vector<8x8xf32> to vector<8xf32>
    %111 = vector.shape_cast %110 : vector<8xf32> to vector<8x1xf32>
    %112 = vector.broadcast %111 : vector<8x1xf32> to vector<8x8xf32>
    %113 = arith.subf %109, %112 : vector<8x8xf32>
    %114 = math.exp %113 : vector<8x8xf32>
    %cst_49 = arith.constant dense<0.000000e+00> : vector<8xf32>
    %115 = vector.multi_reduction <add>, %114, %cst_49 [1] : vector<8x8xf32> to vector<8xf32>
    %116 = vector.shape_cast %115 : vector<8xf32> to vector<8x1xf32>
    %cst_50 = arith.constant 1.000000e-30 : f32
    %117 = vector.broadcast %cst_50 : f32 to vector<8x1xf32>
    %118 = arith.maximumf %116, %117 : vector<8x1xf32>
    %119 = tpu.reciprocal %118 {approx = true} : vector<8x1xf32> -> vector<8x1xf32>
    %120 = vector.broadcast %119 : vector<8x1xf32> to vector<8x8xf32>
    %121 = arith.mulf %114, %120 : vector<8x8xf32>
    %122 = arith.truncf %121 : vector<8x8xf32> to vector<8x8xbf16>
    %cst_51 = arith.constant dense<0.000000e+00> : vector<8x16xf32>
    %123 = tpu.matmul %122, %94, %cst_51 {dimension_numbers = #tpu.dot_dimension_numbers<[1], [0], [0], [1], [0, 0, 1, 1], [], []>} : vector<8x8xbf16>, vector<8x16xbf16>, vector<8x16xf32> -> vector<8x16xf32>
    %c32 = arith.constant 32 : index
    %c0_52 = arith.constant 0 : index
    %124 = vector.load %arg4[%c32, %c0_52] : memref<80x128xf32, #tpu.memory_space<vmem>>, vector<1x16xf32>
    %125 = vector.broadcast %124 : vector<1x16xf32> to vector<8x16xf32>
    %126 = arith.addf %123, %125 : vector<8x16xf32>
    %127 = arith.truncf %126 : vector<8x16xf32> to vector<8x16xbf16>
    %c72 = arith.constant 72 : index
    %c0_53 = arith.constant 0 : index
    %128 = vector.load %arg4[%c72, %c0_53] : memref<80x128xf32, #tpu.memory_space<vmem>>, vector<1x16xf32>
    %129 = vector.broadcast %128 : vector<1x16xf32> to vector<8x16xf32>
    %130 = arith.mulf %126, %129 : vector<8x16xf32>
    %cst_54 = arith.constant dense<0.000000e+00> : vector<8xf32>
    %131 = vector.multi_reduction <add>, %130, %cst_54 [1] : vector<8x16xf32> to vector<8xf32>
    %132 = vector.shape_cast %131 : vector<8xf32> to vector<8x1xf32>
    %c192 = arith.constant 192 : index
    %c0_55 = arith.constant 0 : index
    %133 = vector.load %arg3[%c192, %c0_55] : memref<256x128xbf16, #tpu.memory_space<vmem>>, vector<16x16xbf16>
    %cst_56 = arith.constant dense<0.000000e+00> : vector<8x16xf32>
    %134 = tpu.matmul %127, %133, %cst_56 {dimension_numbers = #tpu.dot_dimension_numbers<[1], [0], [0], [1], [0, 0, 1, 1], [], []>} : vector<8x16xbf16>, vector<16x16xbf16>, vector<8x16xf32> -> vector<8x16xf32>
    %c40 = arith.constant 40 : index
    %c0_57 = arith.constant 0 : index
    %135 = vector.load %arg4[%c40, %c0_57] : memref<80x128xf32, #tpu.memory_space<vmem>>, vector<1x16xf32>
    %136 = vector.broadcast %135 : vector<1x16xf32> to vector<8x16xf32>
    %137 = arith.addf %134, %136 : vector<8x16xf32>
    %cst_58 = arith.constant 0.000000e+00 : f32
    %138 = vector.broadcast %cst_58 : f32 to vector<8x16xf32>
    %139 = arith.maximumf %137, %138 : vector<8x16xf32>
    %140 = arith.truncf %139 : vector<8x16xf32> to vector<8x16xbf16>
    %c208 = arith.constant 208 : index
    %c0_59 = arith.constant 0 : index
    %141 = vector.load %arg3[%c208, %c0_59] : memref<256x128xbf16, #tpu.memory_space<vmem>>, vector<16x2xbf16>
    %cst_60 = arith.constant dense<0.000000e+00> : vector<8x2xf32>
    %142 = tpu.matmul %140, %141, %cst_60 {dimension_numbers = #tpu.dot_dimension_numbers<[1], [0], [0], [1], [0, 0, 1, 1], [], []>} : vector<8x16xbf16>, vector<16x2xbf16>, vector<8x2xf32> -> vector<8x2xf32>
    %c48 = arith.constant 48 : index
    %c0_61 = arith.constant 0 : index
    %143 = vector.load %arg4[%c48, %c0_61] : memref<80x128xf32, #tpu.memory_space<vmem>>, vector<1x2xf32>
    %144 = vector.broadcast %143 : vector<1x2xf32> to vector<8x2xf32>
    %145 = arith.addf %142, %144 : vector<8x2xf32>
    %cst_62 = arith.constant dense<0.000000e+00> : vector<16xf32>
    %146 = vector.multi_reduction <add>, %126, %cst_62 [0] : vector<8x16xf32> to vector<16xf32>
    %147 = vector.shape_cast %146 : vector<16xf32> to vector<1x16xf32>
    %cst_63 = arith.constant 8.000000e+00 : f32
    %148 = vector.broadcast %cst_63 : f32 to vector<1x16xf32>
    %149 = arith.divf %147, %148 : vector<1x16xf32>
    %150 = arith.truncf %149 : vector<1x16xf32> to vector<1x16xbf16>
    %c224 = arith.constant 224 : index
    %c0_64 = arith.constant 0 : index
    %151 = vector.load %arg3[%c224, %c0_64] : memref<256x128xbf16, #tpu.memory_space<vmem>>, vector<16x16xbf16>
    %cst_65 = arith.constant dense<0.000000e+00> : vector<1x16xf32>
    %152 = tpu.matmul %150, %151, %cst_65 {dimension_numbers = #tpu.dot_dimension_numbers<[1], [0], [0], [1], [0, 0, 1, 1], [], []>} : vector<1x16xbf16>, vector<16x16xbf16>, vector<1x16xf32> -> vector<1x16xf32>
    %c56 = arith.constant 56 : index
    %c0_66 = arith.constant 0 : index
    %153 = vector.load %arg4[%c56, %c0_66] : memref<80x128xf32, #tpu.memory_space<vmem>>, vector<1x16xf32>
    %154 = arith.addf %152, %153 : vector<1x16xf32>
    %cst_67 = arith.constant 0.000000e+00 : f32
    %155 = vector.broadcast %cst_67 : f32 to vector<1x16xf32>
    %156 = arith.maximumf %154, %155 : vector<1x16xf32>
    %157 = arith.truncf %156 : vector<1x16xf32> to vector<1x16xbf16>
    %c240 = arith.constant 240 : index
    %c0_68 = arith.constant 0 : index
    %158 = vector.load %arg3[%c240, %c0_68] : memref<256x128xbf16, #tpu.memory_space<vmem>>, vector<16x2xbf16>
    %cst_69 = arith.constant dense<0.000000e+00> : vector<1x2xf32>
    %159 = tpu.matmul %157, %158, %cst_69 {dimension_numbers = #tpu.dot_dimension_numbers<[1], [0], [0], [1], [0, 0, 1, 1], [], []>} : vector<1x16xbf16>, vector<16x2xbf16>, vector<1x2xf32> -> vector<1x2xf32>
    %c64 = arith.constant 64 : index
    %c0_70 = arith.constant 0 : index
    %160 = vector.load %arg4[%c64, %c0_70] : memref<80x128xf32, #tpu.memory_space<vmem>>, vector<1x2xf32>
    %161 = arith.addf %159, %160 : vector<1x2xf32>
    %162 = vector.shape_cast %161 : vector<1x2xf32> to vector<1x2xf32>
    %163 = vector.broadcast %162 : vector<1x2xf32> to vector<8x2xf32>
    %cst_71 = arith.constant 0.000000e+00 : f32
    %164 = vector.broadcast %cst_71 : f32 to vector<8x123xf32>
    %165 = tpu.concatenate %145, %132, %163, %164 in 1 : vector<8x2xf32>, vector<8x1xf32>, vector<8x2xf32>, vector<8x123xf32> -> vector<8x128xf32>
    %c0_72 = arith.constant 0 : index
    %c0_73 = arith.constant 0 : index
    %c0_74 = arith.constant 0 : index
    %166 = vector.load %arg5[%c0_72, %c0_73, %c0_74] : memref<1x8x128xf32, #tpu.memory_space<vmem>>, vector<1x8x128xf32>
    %167 = vector.shape_cast %166 : vector<1x8x128xf32> to vector<8x128xf32>
    %168 = vector.shape_cast %165 : vector<8x128xf32> to vector<1x8x128xf32>
    tpu.vector_store %arg5[%c0_72, %c0_73, %c0_74], %168 {strides = array<i32>} : memref<1x8x128xf32, #tpu.memory_space<vmem>>, vector<1x8x128xf32>,
    return
  }
  func.func @transform_0(%arg0: i32) -> (i32, i32, i32) {
    %c0_i32 = arith.constant 0 : i32
    %c0_i32_0 = arith.constant 0 : i32
    %c0_i32_1 = arith.constant 0 : i32
    return %arg0, %c0_i32, %c0_i32_0 : i32, i32, i32
  }
  func.func @transform_1(%arg0: i32) -> (i32, i32, i32) {
    %c0_i32 = arith.constant 0 : i32
    %c0_i32_0 = arith.constant 0 : i32
    %c0_i32_1 = arith.constant 0 : i32
    return %arg0, %c0_i32, %c0_i32_0 : i32, i32, i32
  }
  func.func @transform_2(%arg0: i32) -> (i32, i32) {
    %c0_i32 = arith.constant 0 : i32
    %c0_i32_0 = arith.constant 0 : i32
    %c0_i32_1 = arith.constant 0 : i32
    return %c0_i32, %c0_i32_0 : i32, i32
  }
  func.func @transform_3(%arg0: i32) -> (i32, i32) {
    %c0_i32 = arith.constant 0 : i32
    %c0_i32_0 = arith.constant 0 : i32
    %c0_i32_1 = arith.constant 0 : i32
    return %c0_i32, %c0_i32_0 : i32, i32
  }
  func.func @transform_4(%arg0: i32) -> (i32, i32, i32) {
    %c0_i32 = arith.constant 0 : i32
    %c0_i32_0 = arith.constant 0 : i32
    %c0_i32_1 = arith.constant 0 : i32
    return %arg0, %c0_i32, %c0_i32_0 : i32, i32, i32
  }
}

</mosaic_0001>

<bundles_post_ra>
// kernel: tpu_custom_call.1
= control target key start
LH: loop header
LB: loop body
LE: loop exit
PB: predicated region body
PF: predicated region fallthrough
CT: control target
= control target key end

     0   :  { %s2188_s0 = inlined_call_operand.hbm [shape: bf16[2,8,96], index: 0, kind: input, shape index: {}]   ;;  %s2189_s1 = inlined_call_operand.hbm [shape: bf16[2,8,8], index: 1, kind: input, shape index: {}]   ;;  %s2190_s2 = inlined_call_operand.hbm [shape: bf16[256,128], index: 2, kind: input, shape index: {}]   ;;  %s2191_s3 = inlined_call_operand.hbm [shape: f32[80,128], index: 3, kind: input, shape index: {}]   ;;  %s2192_s4 = inlined_call_operand.hbm [shape: f32[2,8,128], index: 4, kind: output, shape index: {}]  }
   0x1   :  { %2197 = sst [smem:[#allocation17_spill]] %s2190_s2 }
   0x2   :  { %9 = vsyncpa [#allocation4], 0 }
   0x3   :  { %11 = vsyncpa [#allocation4 + $0x1], 0 }
   0x4   :  { %12 = vsyncpa [#allocation7], 0 }
   0x5   :  { %14 = vsyncpa [#allocation7 + $0x1], 0 }
   0x6   :  { %15 = vsyncpa [#allocation10], 0 }
   0x7   :  { %16 = vsyncpa [#allocation5], 0 }
   0x8   :  { %18 = vsyncpa [#allocation5 + $0x1], 0  ;;  %s1813_s15 = smov 0   ;;  %s1815_s16 = smov 0  }
   0x9   :  { %s1817_s17 = smov 0   ;;  %s1819_s18 = smov 0  }
   0xa LB: > { %s1834_s19 = sadd.s32 4294967295, %s1772_s18   ;;  %s1291_s20 = sadd.s32 4294967294, %s1772_s18   ;;  %s1772_s18 = sphi %s1819_s18, %s2220_s18   ;;  %s1768_s17 = sphi %s1817_s17, %s2219_s17   ;;  %s1764_s16 = sphi %s1815_s16, %s2218_s16   ;;  %s1760_s15 = sphi %s1813_s15, %s2217_s15  }
   0xb   : > { %p44_p0 = scmp.ne.s32.totalorder %s1764_s16, %s1760_s15  ;;  %p2193_p1 = scmp.eq.s32.totalorder %s1834_s19, 0 }
   0xc   : > { %p142_p3 = scmp.eq.s32.totalorder %s1291_s20, 1  ;;  %p1292_p5 = scmp.ge.s32.totalorder %s1772_s18, 1 }
   0xd   : > { %p1843_p4 = por %p2193_p1, %p44_p0  ;;  %p149_p7 = scmp.lt.s32.totalorder %s1772_s18, 3 }
   0xe   : > { %p1848_p6 = por %p142_p3, %p44_p0  ;;  %s1774_s24 = smov [#allocation8]  }
   0xf   : > { %s2198_s21 = scalar_select %p1843_p4, 1, 0 }
  0x10   : > { %s2199_s22 = scalar_select %p1848_p6, 1, 0 }
  0x11   : > { %p1853_p8 = pnand %p1292_p5, %p149_p7  ;;  %s161_s25 = sshll.u32 %s1774_s24, 4  ;;  %s1857_s25 = int_to_ptr.vmem [resolvable:$true] %s161_s25 }
  0x12   : > { %s1775_s27 = smov [#allocation9]   ;;  %s2202_s2 = sld [smem:[#allocation17_spill]] }
  0x13   : > { %s2200_s23 = scalar_select %p1853_p8, 1, 0 }
  0x14   : > { %p1484_p9 = pneg %p1853_p8  ;;  %s174_s28 = sshll.u32 %s1775_s27, 4  ;;  %s1868_s28 = int_to_ptr.vmem [resolvable:$true] %s174_s28 }
  0x16   : > { %p1864_p11 = pnand %p1484_p9, %p2193_p1 }
  0x18   : > { %s1578_s5 = scalar_lea.hbm %s2202_s2, 2048  ;;  %p1580_p13 = pneg %p1864_p11 }
  0x19   : > { %p1579_p12 = scmp.ne.s32.totalorder %s2202_s2, %s1578_s5  ;;  %p1585_p5 = scmp.lt.u32.totalorder %s1578_s5, %s2202_s2 }
  0x1b   : > { %p1581_p0 = pnand %p1580_p13, %p1579_p12 }
  0x1d   : > { %p1582_p3 = pneg %p1581_p0 }
  0x1f   : > { %p1587_p7 = pnand %p1585_p5, %p1582_p3 }
  0x21   : > { %1590 = shalt.err (!%p1587_p7)
}
  0x22   : > { %s1591_s10 = scalar_lea.vmem %s1857_s25, 2048  ;;  %p1599_p2 = scmp.lt.s32.totalorder %s1857_s25, %s1857_s25 }
  0x23   : > { %p1592_p9 = scmp.ne.s32.totalorder %s1857_s25, %s1591_s10  ;;  %p1600_p12 = scmp.lt.s32.totalorder %s1591_s10, %s1591_s10 }
  0x25   : > { %p1594_p10 = pnand %p1592_p9, %p1580_p13  ;;  %p1601_p0 = por %p1600_p12, %p1599_p2 }
  0x27   : > { %p1595_p1 = pneg %p1594_p10 }
  0x29   : > { %p1602_p6 = pnand %p1601_p0, %p1595_p1 }
  0x2b   : > { %1605 = shalt.err (!%p1602_p6)
}
  0x2c   : > { %s1776_s11 = smov 64   ;;  %s1777_s12 = smov 4  }
  0x2d   : > { %1487 = dma.hbm_to_vmem [thread:$0]  (!%p1864_p11), %s2202_s2, 2048, %s1857_s25, [#allocation7], %s1776_s11, %s1776_s11, %s1777_s12  }
  0x2e   : > { %s1606_s27 = scalar_lea.hbm %s2191_s3, 1280 }
  0x2f   : > { %p1607_p2 = scmp.ne.s32.totalorder %s2191_s3, %s1606_s27  ;;  %p1613_p10 = scmp.lt.u32.totalorder %s1606_s27, %s2191_s3 }
  0x31   : > { %p1609_p1 = pnand %p1607_p2, %p1580_p13 }
  0x33   : > { %p1610_p6 = pneg %p1609_p1 }
  0x35   : > { %p1615_p3 = pnand %p1613_p10, %p1610_p6 }
  0x37   : > { %1618 = shalt.err (!%p1615_p3)
}
  0x38   : > { %s1619_s25 = scalar_lea.vmem %s1868_s28, 1280  ;;  %p1627_p12 = scmp.lt.s32.totalorder %s1868_s28, %s1868_s28 }
  0x39   : > { %p1620_p5 = scmp.ne.s32.totalorder %s1868_s28, %s1619_s25  ;;  %p1628_p0 = scmp.lt.s32.totalorder %s1619_s25, %s1619_s25 }
  0x3b   : > { %p1622_p7 = pnand %p1620_p5, %p1580_p13  ;;  %p1629_p2 = por %p1628_p0, %p1627_p12 }
  0x3d   : > { %p1623_p9 = pneg %p1622_p7 }
  0x3f   : > { %p1630_p1 = pnand %p1629_p2, %p1623_p9 }
  0x41   : > { %1633 = shalt.err (!%p1630_p1)
}
  0x42   : > { %s1778_s7 = smov 128   ;;  %s1779_s8 = smov 8  }
  0x43   : > { %1490 = dma.hbm_to_vmem [thread:$0]  (!%p1864_p11), %s2191_s3, 1280, %s1868_s28, [#allocation10], %s1778_s7, %s1778_s7, %s1779_s8  }
  0x44   : > { %s1923_s11 = sadd.s32 1, %s1772_s18   ;;  %s31_s13 = sadd.s32 1, %s1768_s17 }
  0x45   : > { %s28_s12 = ssub.s32 %s1772_s18, %s1923_s11  ;;  %p38_p6 = scmp.ne.s32.totalorder %s1768_s17, %s1764_s16 }
  0x46   : > { %p29_p13 = scmp.eq.s32.totalorder %s28_s12, 0  ;;  %p39_p10 = scmp.eq.s32.totalorder %s1772_s18, 0 }
  0x47   : > { %p2203_p5 = scmp.eq.s32.totalorder %s1834_s19, 1  ;;  %p1504_p9 = scmp.lt.s32.totalorder %s1772_s18, 2 }
  0x48   : > { %s1932_s14 = scalar_select %p29_p13, %s1768_s17, %s31_s13  }
  0x49   : > { %p40_p3 = por %p39_p10, %p38_p6  ;;  %p1936_p7 = por %p2203_p5, %p38_p6 }
  0x4a   : > { %s188_s26 = sand.u32 1, %s1768_s17   ;;  %s1297_s24 = sshll.u32 %s1772_s18, 6 }
  0x4b   : > { %s2204_s20 = scalar_select %p1936_p7, 1, 0 }
  0x4c   : > { %s1942_s28 = sshll.u32 %s188_s26, 2  ;;  %s1948_s30 = scalar_lea.hbm %s2188_s0, %s1297_s24 }
  0x4d   : > { %s192_s5 = scalar_lea.vmem [#allocation3], %s1942_s28  ;;  %p1953_p11 = pnand %p1504_p9, %p40_p3 }
  0x4e   : > { %s199_s6 = sshll.u32 %s192_s5, 4  ;;  %s1960_s9 = scalar_lea.hbm %s2189_s1, %s1297_s24  ;;  %s1951_s6 = int_to_ptr.vmem [resolvable:$true] %s199_s6 }
  0x4f   : > { %s206_s10 = sand.u32 1, %s1772_s18   ;;  %s189_s12 = scalar_lea.sflag [#allocation4], %s188_s26 }
  0x50   : > { %s1634_s13 = scalar_lea.hbm %s1948_s30, 64  ;;  %p1636_p0 = pneg %p1953_p11 }
  0x51   : > { %p1635_p12 = scmp.ne.s32.totalorder %s1948_s30, %s1634_s13  ;;  %s1639_s5 = scalar_lea.hbm %s2188_s0, 128 }
  0x52   : > { %p1640_p13 = scmp.lt.u32.totalorder %s1948_s30, %s2188_s0  ;;  %p1641_p6 = scmp.lt.u32.totalorder %s1639_s5, %s1634_s13 }
  0x53   : > { %p1637_p2 = pnand %p1636_p0, %p1635_p12  ;;  %p1643_p3 = scmp.lt.u32.totalorder %s1634_s13, %s1948_s30 }
  0x54   : > { %p1642_p10 = por %p1641_p6, %p1640_p13 }
  0x55   : > { %p1638_p1 = pneg %p1637_p2 }
  0x56   : > { %p1644_p5 = por %p1643_p3, %p1642_p10 }
  0x58   : > { %p1645_p9 = pnand %p1644_p5, %p1638_p1 }
  0x5a   : > { %1648 = shalt.err (!%p1645_p9)
}
  0x5b   : > { %s1649_s26 = scalar_lea.vmem %s1951_s6, 64  ;;  %s1780_s24 = smov [#allocation3]  }
  0x5c   : > { %p1650_p12 = scmp.ne.s32.totalorder %s1951_s6, %s1649_s26  ;;  %s1654_s8 = sshll.u32 %s1780_s24, 4  ;;  %s1655_s8 = int_to_ptr.vmem [resolvable:$false] %s1654_s8 }
  0x5d   : > { %s1656_s2 = scalar_lea.vmem %s1655_s8, 128  ;;  %p1657_p4 = scmp.lt.s32.totalorder %s1951_s6, %s1655_s8 }
  0x5e   : > { %p1652_p2 = pnand %p1650_p12, %p1636_p0  ;;  %p1658_p13 = scmp.lt.s32.totalorder %s1656_s2, %s1649_s26 }
  0x60   : > { %p1653_p7 = pneg %p1652_p2  ;;  %p1659_p6 = por %p1658_p13, %p1657_p4 }
  0x62   : > { %p1660_p10 = pnand %p1659_p6, %p1653_p7 }
  0x64   : > { %1663 = shalt.err (!%p1660_p10)
}
  0x65   : > { %1494 = dma.hbm_to_vmem [thread:$0]  (!%p1953_p11), %s1948_s30, 64, %s1951_s6, %s189_s12  }
  0x66   : > { %s210_s13 = scalar_lea.vmem [#allocation6], %s1942_s28  ;;  %s207_s29 = scalar_lea.sflag [#allocation7], %s206_s10 }
  0x67   : > { %s217_s27 = sshll.u32 %s210_s13, 4  ;;  %s1664_s5 = scalar_lea.hbm %s1960_s9, 64  ;;  %s218_s27 = int_to_ptr.vmem [resolvable:$true] %s217_s27 }
  0x68   : > { %p1665_p4 = scmp.ne.s32.totalorder %s1960_s9, %s1664_s5  ;;  %s1669_s24 = scalar_lea.hbm %s2189_s1, 128 }
  0x69   : > { %p1670_p3 = scmp.lt.u32.totalorder %s1960_s9, %s2189_s1  ;;  %p1671_p5 = scmp.lt.u32.totalorder %s1669_s24, %s1664_s5 }
  0x6a   : > { %p1667_p7 = pnand %p1665_p4, %p1636_p0  ;;  %p1673_p12 = scmp.lt.u32.totalorder %s1664_s5, %s1960_s9 }
  0x6b   : > { %p1672_p9 = por %p1671_p5, %p1670_p3 }
  0x6c   : > { %p1668_p1 = pneg %p1667_p7 }
  0x6d   : > { %p1674_p2 = por %p1673_p12, %p1672_p9 }
  0x6f   : > { %p1675_p13 = pnand %p1674_p2, %p1668_p1 }
  0x71   : > { %1678 = shalt.err (!%p1675_p13)
}
  0x72   : > { %s1679_s28 = scalar_lea.vmem %s218_s27, 64  ;;  %s1781_s30 = smov [#allocation6]  }
  0x73   : > { %p1680_p6 = scmp.ne.s32.totalorder %s218_s27, %s1679_s28  ;;  %s1684_s6 = sshll.u32 %s1781_s30, 4  ;;  %s1685_s6 = int_to_ptr.vmem [resolvable:$false] %s1684_s6 }
  0x74   : > { %s1686_s10 = scalar_lea.vmem %s1685_s6, 128  ;;  %p1687_p7 = scmp.lt.s32.totalorder %s218_s27, %s1685_s6 }
  0x75   : > { %p1682_p10 = pnand %p1680_p6, %p1636_p0  ;;  %p1688_p8 = scmp.lt.s32.totalorder %s1686_s10, %s1679_s28 }
  0x77   : > { %p1683_p4 = pneg %p1682_p10  ;;  %p1689_p3 = por %p1688_p8, %p1687_p7 }
  0x79   : > { %p1690_p5 = pnand %p1689_p3, %p1683_p4 }
  0x7b   : > { %1693 = shalt.err (!%p1690_p5)
}
  0x7c   : > { %1497 = dma.hbm_to_vmem [thread:$0]  (!%p1953_p11), %s1960_s9, 64, %s218_s27, %s207_s29  }
  0x7d   : > { %p2206_p1 = scmp.ne.s32.totalorder %s2200_s23, 0 }
  0x7e   : > { %s2013_s12 = sand.u32 (!%p2206_p1), 1, %s1764_s16   ;;  %p2207_p8 = scmp.ne.s32.totalorder (!%p2206_p1), %s2198_s21, 0 }
  0x7f   : > { %226 = sbr.rel (%p2206_p1) target bundleno = 3199 (0xc7f), region = 36  ;;  %s1301_s13 = sshll.u32 (!%p2206_p1), %s2013_s12, 2 }
  0x80   : > { %s229_s5 = scalar_lea.sflag (!%p2206_p1), [#allocation4], %s2013_s12  ;;  %s2017_s7 = scalar_lea.vmem (!%p2206_p1), [#allocation3], %s1301_s13 }
  0x86   : > { %1739 = dma.done.wait (%p2207_p8), %s229_s5, 64  }
  0x87   : > { %1741 = vsyncadd (%p2207_p8), %s229_s5, 4294967232  ;;  %s237_s25 = sand.u32 1, %s1834_s19   ;;  %s2024_s9 = scalar_lea.vmem [#allocation6], %s1301_s13 }
  0x88   : > { %s238_s23 = scalar_lea.sflag [#allocation7], %s237_s25 }
  0x89   : > { %1743 = dma.done.wait (%p2207_p8), %s238_s23, 64  }
  0x8a   : > { %1745 = vsyncadd (%p2207_p8), %s238_s23, 4294967232  ;;  %p2208_p11 = scmp.eq.s32.totalorder %s1834_s19, 0 }
  0x8c   : > { %1747 = dma.done.wait (%p2208_p11), [#allocation7], 2048   ;;  %p2209_p0 = pmov %p2208_p11 }
  0x8e   : > { %1749 = vsyncadd (%p2209_p0), [#allocation7], 4294965248  ;;  %p2210_p9 = pmov %p2209_p0 }
  0x8f   : > { %p2211_p12 = pmov %p2209_p0 }
  0x90   : > { %1751 = dma.done.wait (%p2210_p9), [#allocation10], 1280  }
  0x91   : > { %1753 = vsyncadd (%p2211_p12), [#allocation10], 4294966016  ;;  %v1782_v0 = vmov 0.0   ;;  %vm1783_vm0 = vmmov 0   ;;  %v1551_v1 = vld [vmem:[#allocation8] sm:$0xff]   ;;  %v1552_v2 = vld [vmem:[#allocation8 + $0x8] sm:$0xff]   ;;  %v492_v17 = vlaneseq }
  0x92   : > { %1378 = vmatprep.subr.bf16.mxu0 %v1782_v0  ;;  %1390 = vmatprep.mubr.msk.bf16.mxu0 %vm1783_vm0, %v1782_v0  ;;  %v1553_v3 = vld [vmem:[#allocation8 + $0x10] sm:$0xff]   ;;  %v1554_v5 = vld [vmem:[#allocation8 + $0x18] sm:$0xff]   ;;  %v1555_v6 = vld [vmem:[#allocation8 + $0x20] sm:$0xff]   ;;  %vm337_vm1 = vcmask 785408   ;;  %vm398_vm2 = vcmask 261120   ;;  %vm445_vm3 = vcmask 130048  }
  0x93   : > { %1394 = vmatprep.subr.bf16.mxu1 %v1782_v0  ;;  %1398 = vmatprep.mubr.msk.bf16.mxu1 %vm1783_vm0, %v1782_v0  ;;  %v1557_v4 = vld [vmem:[#allocation8 + $0x30] sm:$0xff]   ;;  %v1556_v7 = vld [vmem:[#allocation8 + $0x28] sm:$0xff]   ;;  %v1558_v9 = vld [vmem:[#allocation8 + $0x38] sm:$0xff]   ;;  %v493_v18 = vshrl.u32 %v492_v17, 7  ;;  %s1784_s21 = smov 112   ;;  %s1785_s27 = smov 16  }
  0x94   : > { %1379 = vmatpush3.bf16.msra.mxu0 %v1551_v1  ;;  %1395 = vmatpush3.bf16.msra.mxu1 %v1557_v4  ;;  %v283_v8 = vld [vmem:[%s2017_s7] sm:$0xf]  ;;  %v1306_v10 = vld [vmem:[#allocation9] ss:$0 sm:$0xff]  ;;  %v443_v20 = vld [vmem:[#allocation9 + $0x8] sm:$0x3] }
  0x95   : > { %1380 = vmatprep.subr.bf16.mxu0 %v1782_v0  ;;  %1396 = vmatprep.subr.bf16.mxu1 %v1782_v0  ;;  %v2058_v19 = vsub.s32 0, %v493_v18  ;;  %v627_v22 = vsub.s32 1, %v493_v18  ;;  %v442_v31 = vld [vmem:[#allocation8 + $0x40] sm:$0x1]  ;;  %vm526_vm4 = vcmask 1043456   ;;  %vm509_vm7 = vcmask 64512  }
  0x96   : > { %v1319_v34 = vcombine.low %v442_v31, %v442_v31  ;;  %v280_v46 = vld [vmem:[%s2024_s9] sm:$0xf]  ;;  %vm712_vm9 = vcmask 261248   ;;  %v1562_v52 = vld [vmem:[#allocation8 + $0x60] sm:$0xff]   ;;  %s1786_s29 = smov 3   ;;  %s1305_s26 = sshll.u32 %s2013_s12, 3 }
  0x97   : > { %v495_v21 = vrot.slane %v443_v20, %v2058_v19  ;;  %v628_v30 = vrot.slane %v443_v20, %v627_v22  ;;  %v281_v48 = vunpack.c.l.bf16 %v280_v46  ;;  %vm1158_vm11 = vcmask 15360   ;;  %s1342_s24 = sshll.u32 %s1834_s19, 7  ;;  %s278_s8 = scalar_lea.vmem [#allocation11], %s1305_s26 }
  0x98   : > { %1381 = vmatpush3.bf16.msra.mxu0 %v1552_v2  ;;  %1397 = vmatpush3.bf16.msra.mxu1 %v1558_v9  ;;  %v574_v37 = vshrl.u32 %v1319_v34, 16  ;;  %vm1160_vm12 = vcmask 23552   ;;  %s1179_s2 = sshll.u32 %s278_s8, 4  ;;  %vm1162_vm13 = vcmask 39936   ;;  %s2144_s6 = scalar_lea.hbm %s2192_s4, %s1342_s24  ;;  %s2146_s2 = int_to_ptr.vmem [resolvable:$true] %s1179_s2 }
  0x99   : > { %1382 = vmatprep.subr.bf16.mxu0 %v1782_v0  ;;  %1402 = vmatprep.subr.bf16.mxu1 %v1782_v0  ;;  %vm2081_vm5 = vcmp.gt.f32.partialorder %v281_v48, 0.0  ;;  %s1166_s10 = scalar_lea.sflag [#allocation5], %s2013_s12  ;;  %s1694_s19 = scalar_lea.vmem %s2146_s2, 128 }
  0x9a   : > { %p1695_p2 = scmp.ne.s32.totalorder %s2146_s2, %s1694_s19  ;;  %p2214_p13 = scmp.ne.s32.totalorder %s2204_s20, 0 }
  0x9b   : > { %s1787_s13 = smov [#allocation11]  }
  0x9c   : > { %1383 = vmatpush3.bf16.msra.mxu0 %v1553_v3  ;;  %p1696_p6 = pnand %p1695_p2, %p2214_p13  ;;  %s1698_s5 = sshll.u32 %s1787_s13, 4  ;;  %s1699_s5 = int_to_ptr.vmem [resolvable:$false] %s1698_s5 }
  0x9d   : > { %1384 = vmatprep.subr.bf16.mxu0 %v1782_v0  ;;  %s1700_s7 = scalar_lea.vmem %s1699_s5, 256  ;;  %p1701_p4 = scmp.lt.s32.totalorder %s2146_s2, %s1699_s5 }
  0x9e   : > { %p1697_p10 = pneg %p1696_p6  ;;  %p1702_p7 = scmp.lt.s32.totalorder %s1700_s7, %s1694_s19 }
  0xa0   : > { %1385 = vmatpush3.bf16.msra.mxu0 %v1554_v5  ;;  %p1703_p3 = por %p1702_p7, %p1701_p4 }
  0xa1   : > { %1386 = vmatprep.subr.bf16.mxu0 %v1782_v0 }
  0xa2   : > { %p1704_p5 = pnand %p1703_p3, %p1697_p10 }
  0xa4   : > { %1387 = vmatpush3.bf16.msra.mxu0 %v1555_v6 }
  0xa5   : > { %1388 = vmatprep.subr.bf16.mxu0 %v1782_v0 }
  0xa8   : > { %1389 = vmatpush3.bf16.msra.mxu0 %v1556_v7 }
  0xa9   : > { %1414 = vmatprep.subr.bf16.mxu0 %v1782_v0 }
  0xab   : > { %1391 = vmatmul.mubr.msk.bf16.vlgmr.msra.gmra.mrb[0].mxu0 %vm337_vm1, %v283_v8 }
  0xac   : > { %1416 = vmatprep.mubr.msk.bf16.mxu0 %vm1783_vm0, %v1782_v0 }
 0x17e   : > { %v375_v11 = vpop.f32.mrb[0].mxu0 }
 0x17f   : > { %v376_v12 = vadd.f32 %v1306_v10, %v375_v11  ;;  %v1392_v13 = vpop.f32.mrb[1].mxu0 }
 0x180   : > { %v378_v14 = vpop.f32.mrb[2].mxu0 }
 0x181   : > { %v381_v15 = vpack.c.bf16 %v376_v12, %v376_v12  ;;  %v1393_v16 = vpop.f32.mrb[3].mxu0 }
 0x183   : > { %1399 = vmatmul.mubr.msk.bf16.vlgmr.msra.gmra.mrb[0].mxu1 %vm398_vm2, %v381_v15 }
 0x184   : > { %1404 = vmatprep.mubr.msk.bf16.mxu1 %vm1783_vm0, %v1782_v0 }
 0x256   : > { %v436_v23 = vpop.f32.mrb[0].mxu1 }
 0x257   : > { %v444_v24 = vpack.c.bf16 %v436_v23, %v436_v23  ;;  %v1400_v25 = vpop.f32.mrb[1].mxu1  ;;  %v496_v26 = vmul.f32 %v495_v21, %v436_v23 }
 0x258   : > { %v439_v27 = vpop.f32.mrb[2].mxu1 }
 0x259   : > { %577 = vrot.lane.b32.xlu0 %v444_v24, %s1784_s21  ;;  %v1401_v28 = vpop.f32.mrb[3].mxu1  ;;  %v450_v29 = vsel %vm445_vm3, %v444_v24, 0  ;;  %v527_v32 = vsel %vm526_vm4, %v444_v24, 0  ;;  %v497_v39 = vsel %vm445_vm3, %v496_v26, 0.0 }
 0x25a   : > { %1403 = vmatpush3.bf16.xpose.msra.mxu1 %v450_v29 }
 0x25b   : > { %1408 = vmatprep.subr.bf16.mxu1 %v1782_v0 }
 0x25d   : > { %630 = vrot.lane.b32.xlu0 %v628_v30, %s1785_s27  ;;  %v1560_v30 = vld [vmem:[#allocation8 + $0x48] sm:$0xff]  }
 0x261   : > { %1405 = vmatmul.mubr.msk.bf16.vlgmr.msra.gmra.mrb[4].mxu1 %vm445_vm3, %v442_v31  ;;  %v1561_v31 = vld [vmem:[#allocation8 + $0x50] sm:$0xff]  }
 0x262   : > { %1409 = vmatpush3.bf16.msra.mxu1 %v527_v32  ;;  %1410 = vmatprep.mubr.msk.bf16.mxu1 %vm1783_vm0, %v1782_v0 }
 0x263   : > { %1420 = vmatprep.subr.bf16.mxu1 %v1782_v0 }
 0x2cb   : > { %v2069_v33 = vpop.permute.xlu0 %577 }
 0x2cc   : > { %v583_v35 = vsel %vm445_vm3, %v2069_v33, 0  ;;  %v666_v20 = vsel %vm526_vm4, %v2069_v33, 0 }
 0x2cd   : > { %1415 = vmatpush3.bf16.xpose.msra.mxu0 %v583_v35 }
 0x2ce   : > { %1426 = vmatprep.subr.bf16.mxu0 %v1782_v0 }
 0x2cf   : > { %v631_v36 = vpop.permute.xlu0 %630 }
 0x2d0   : > { %v633_v38 = vmul.f32 %v631_v36, %v436_v23 }
 0x2d2   : > { %635 = vrot.lane.b32.xlu1 %v633_v38, %s1784_s21 }
 0x2d4   : > { %1417 = vmatmul.mubr.msk.bf16.vlgmr.msra.gmra.mrb[4].mxu0 %vm445_vm3, %v574_v37  ;;  %v1322_v37 = vld [vmem:[#allocation9 + $0x10] ss:$0 sm:$0xff] }
 0x2d5   : > { %1430 = vmatprep.mubr.msk.bf16.mxu0 %vm1783_vm0, %v1782_v0  ;;  %1427 = vmatpush3.bf16.msra.mxu0 %v1560_v30 }
 0x2d6   : > { %1428 = vmatprep.subr.bf16.mxu0 %v1782_v0 }
 0x2d9   : > { %1429 = vmatpush3.bf16.msra.mxu0 %v1561_v31 }
 0x2da   : > { %1440 = vmatprep.subr.bf16.mxu0 %v1782_v0 }
 0x2f6   : > { %498 = vadd.xlane.f32.xlu1 %v497_v39 }
 0x334   : > { %v486_v40 = vpop.f32.mrb[4].mxu1 }
 0x335   : > { %v1406_v41 = vpop.f32.mrb[5].mxu1  ;;  %v503_v47 = vrot.slane %v486_v40, %v2058_v19 }
 0x336   : > { %v489_v42 = vpop.f32.mrb[6].mxu1  ;;  %v1327_v41 = vld [vmem:[#allocation9 + $0x18] ss:$0 sm:$0xff] }
 0x337   : > { %v1407_v43 = vpop.f32.mrb[7].mxu1 }
 0x344   : > { %v636_v44 = vpop.permute.xlu1 %635 }
 0x345   : > { %v638_v45 = vsel %vm445_vm3, %v636_v44, 0.0 }
 0x346   : > { %639 = vadd.xlane.f32.xlu0 %v638_v45 }
 0x383   : > { %v499_v49 = vpop.xlane.xlu1 %498 }
 0x384   : > { %v504_v50 = vadd.f32 %v503_v47, %v499_v49 }
 0x386   : > { %v506_v51 = vmul.f32 0.2, %v504_v50  ;;  %vm505_vm6 = vcmp.gt.f32.partialorder %v504_v50, 0.0 }
 0x388   : > { %v507_v53 = vsel %vm505_vm6, %v504_v50, %v506_v51  ;;  %v781_v51 = vld [vmem:[#allocation8 + $0x58] sm:$0x1] }
 0x389   : > { %v508_v54 = vsel %vm2081_vm5, %v507_v53, -1e+30 }
 0x38a   : > { %v510_v55 = vsel %vm509_vm7, %v508_v54, -inf }
 0x38b   : > { %511 = vmax.xlane.f32.xlu0 %v510_v55 }
 0x3a7   : > { %v619_v56 = vpop.f32.mrb[4].mxu0 }
 0x3a8   : > { %v1418_v57 = vpop.f32.mrb[5].mxu0  ;;  %v644_v60 = vrot.slane %v619_v56, %v2058_v19 }
 0x3a9   : > { %v622_v58 = vpop.f32.mrb[6].mxu0 }
 0x3aa   : > { %v1419_v59 = vpop.f32.mrb[7].mxu0 }
 0x3d3   : > { %v640_v61 = vpop.xlane.xlu0 %639 }
 0x3d4   : > { %v645_v62 = vadd.f32 %v644_v60, %v640_v61 }
 0x3d6   : > { %v647_v63 = vmul.f32 0.2, %v645_v62  ;;  %vm646_vm8 = vcmp.gt.f32.partialorder %v645_v62, 0.0 }
 0x3d8   : > { %v648_v1 = vsel %vm646_vm8, %v645_v62, %v647_v63 }
 0x3d9   : > { %v649_v2 = vsel %vm2081_vm5, %v648_v1, -1e+30 }
 0x3da   : > { %v650_v3 = vsel %vm509_vm7, %v649_v2, -inf }
 0x3db   : > { %651 = vmax.xlane.f32.xlu1 %v650_v3 }
 0x418   : > { %v512_v4 = vpop.xlane.xlu0 %511 }
 0x419   : > { %v513_v5 = vsub.f32 %v508_v54, %v512_v4 }
 0x41b   : > { %v514_v6 = vmul.f32 1.442695, %v513_v5 }
 0x41d   : > { %1566 = vpow2.f32 %v514_v6 }
 0x427   : > { %v1567_v7 = vpop.eup %1566 }
 0x428   : > { %v516_v8 = vsel %vm509_vm7, %v1567_v7, 0.0 }
 0x429   : > { %517 = vadd.xlane.f32.xlu0 %v516_v8 }
 0x468   : > { %v652_v9 = vpop.xlane.xlu1 %651 }
 0x469   : > { %v653_v10 = vsub.f32 %v649_v2, %v652_v9 }
 0x46b   : > { %v654_v11 = vmul.f32 1.442695, %v653_v10 }
 0x46d   : > { %1568 = vpow2.f32 %v654_v11  ;;  %v1328_v11 = vld [vmem:[#allocation9 + $0x20] ss:$0 sm:$0xff] }
 0x477   : > { %v1569_v12 = vpop.eup %1568 }
 0x478   : > { %v656_v13 = vsel %vm509_vm7, %v1569_v12, 0.0 }
 0x479   : > { %657 = vadd.xlane.f32.xlu1 %v656_v13  ;;  %v1330_v13 = vld [vmem:[#allocation9 + $0x48] ss:$0 sm:$0xff] }
 0x4b6   : > { %v518_v14 = vpop.xlane.xlu0 %517 }
 0x4b7   : > { %v519_v15 = vmax.f32 %v518_v14, 1e-30 }
 0x4b9   : > { %1570 = vrcp.f32 %v519_v15 }
 0x4c3   : > { %v1571_v16 = vpop.eup %1570 }
 0x4c4   : > { %v521_v17 = vmul.f32 %v1571_v16, %v1567_v7 }
 0x4c6   : > { %v522_v18 = vpack.c.bf16 %v521_v17, %v521_v17  ;;  %v1563_v17 = vld [vmem:[#allocation8 + $0x70] sm:$0xff]  }
 0x4c8   : > { %1411 = vmatmul.mubr.msk.bf16.vlgmr.msra.gmra.mrb[8].mxu1 %vm509_vm7, %v522_v18 }
 0x4c9   : > { %1421 = vmatpush3.bf16.msra.mxu1 %v666_v20  ;;  %1422 = vmatprep.mubr.msk.bf16.mxu1 %vm1783_vm0, %v1782_v0 }
 0x4ca   : > { %1434 = vmatprep.subr.bf16.mxu1 %v1782_v0 }
 0x506   : > { %v658_v21 = vpop.xlane.xlu1 %657 }
 0x507   : > { %v659_v22 = vmax.f32 %v658_v21, 1e-30 }
 0x509   : > { %1572 = vrcp.f32 %v659_v22 }
 0x513   : > { %v1573_v23 = vpop.eup %1572 }
 0x514   : > { %v661_v24 = vmul.f32 %v1573_v23, %v1569_v12 }
 0x516   : > { %v662_v25 = vpack.c.bf16 %v661_v24, %v661_v24 }
 0x518   : > { %1423 = vmatmul.mubr.msk.bf16.vlgmr.msra.gmra.mrb[12].mxu1 %vm509_vm7, %v662_v25 }
 0x519   : > { %1436 = vmatprep.mubr.msk.bf16.mxu1 %vm1783_vm0, %v1782_v0 }
 0x59b   : > { %v563_v26 = vpop.f32.mrb[8].mxu1 }
 0x59c   : > { %569 = vst.msk [vmem:[#allocation2] sm:$0xff] %vm445_vm3, %v563_v26  ;;  %v1412_v27 = vpop.f32.mrb[9].mxu1 }
 0x59d   : > { %v566_v28 = vpop.f32.mrb[10].mxu1 }
 0x59e   : > { %v1413_v29 = vpop.f32.mrb[11].mxu1 }
 0x5eb   : > { %v702_v32 = vpop.f32.mrb[12].mxu1 }
 0x5ec   : > { %709 = vrot.lane.b32.xlu0 %v702_v32, %s1785_s27  ;;  %v1424_v33 = vpop.f32.mrb[13].mxu1  ;;  %v1564_v32 = vld [vmem:[#allocation8 + $0x68] sm:$0xff]  }
 0x5ed   : > { %v705_v34 = vpop.f32.mrb[14].mxu1  ;;  %v1331_v33 = vld [vmem:[#allocation9 + $0x28] ss:$0 sm:$0xff] }
 0x5ee   : > { %v1425_v35 = vpop.f32.mrb[15].mxu1 }
 0x65e   : > { %v710_v36 = vpop.permute.xlu0 %709 }
 0x65f   : > { %713 = vst.msk [vmem:[#allocation2] sm:$0xff] %vm712_vm9, %v710_v36 }
 0x666   : > { %v714_v38 = vld [vmem:[#allocation2] sm:$0xff] }
 0x667   : > { %v720_v39 = vadd.f32 %v1322_v37, %v714_v38 }
 0x669   : > { %v721_v40 = vpack.c.bf16 %v720_v39, %v720_v39 }
 0x66b   : > { %1431 = vmatmul.mubr.msk.bf16.vlgmr.msra.gmra.mrb[8].mxu0 %vm398_vm2, %v721_v40  ;;  %v1565_v40 = vld [vmem:[#allocation8 + $0x78] sm:$0xff]  }
 0x66c   : > { %1442 = vmatprep.mubr.msk.bf16.mxu0 %vm1783_vm0, %v1782_v0 }
 0x73e   : > { %v775_v42 = vpop.f32.mrb[8].mxu0 }
 0x73f   : > { %v783_v43 = vpack.c.bf16 %v775_v42, %v775_v42  ;;  %v834_v44 = vmul.f32 %v1327_v41, %v775_v42  ;;  %v1432_v45 = vpop.f32.mrb[9].mxu0  ;;  %v1046_v42 = vld [vmem:[#allocation9 + $0x38] sm:$0x1] }
 0x740   : > { %v778_v46 = vpop.f32.mrb[10].mxu0 }
 0x741   : > { %v1433_v47 = vpop.f32.mrb[11].mxu0  ;;  %v835_v48 = vsel %vm445_vm3, %v834_v44, 0.0  ;;  %v788_v49 = vsel %vm445_vm3, %v783_v43, 0  ;;  %v868_v50 = vsel %vm526_vm4, %v783_v43, 0 }
 0x742   : > { %836 = vadd.xlane.f32.xlu1 %v835_v48  ;;  %1435 = vmatpush3.bf16.xpose.msra.mxu1 %v788_v49 }
 0x743   : > { %1441 = vmatpush3.bf16.msra.mxu0 %v868_v50  ;;  %1446 = vmatprep.subr.bf16.mxu1 %v1782_v0 }
 0x744   : > { %1452 = vmatprep.subr.bf16.mxu0 %v1782_v0 }
 0x749   : > { %1437 = vmatmul.mubr.msk.bf16.vlgmr.msra.gmra.mrb[16].mxu1 %vm445_vm3, %v781_v51 }
 0x74a   : > { %1448 = vmatprep.mubr.msk.bf16.mxu1 %vm1783_vm0, %v1782_v0  ;;  %1447 = vmatpush3.bf16.msra.mxu1 %v1562_v52 }
 0x74b   : > { %1458 = vmatprep.subr.bf16.mxu1 %v1782_v0 }
 0x7cf   : > { %v837_v56 = vpop.xlane.xlu1 %836 }
 0x81c   : > { %v824_v53 = vpop.f32.mrb[16].mxu1 }
 0x81d   : > { %v841_v54 = vrot.slane %v824_v53, %v2058_v19  ;;  %v1438_v55 = vpop.f32.mrb[17].mxu1 }
 0x81e   : > { %v827_v57 = vpop.f32.mrb[18].mxu1  ;;  %v1100_v55 = vld [vmem:[#allocation9 + $0x40] sm:$0x1] }
 0x81f   : > { %v842_v58 = vadd.f32 %v841_v54, %v837_v56  ;;  %v1439_v59 = vpop.f32.mrb[19].mxu1 }
 0x821   : > { %vm843_vm10 = vcmp.gt.f32.partialorder %v842_v58, 0.0  ;;  %v844_v60 = vmul.f32 0.2, %v842_v58 }
 0x823   : > { %v845_v61 = vsel %vm843_vm10, %v842_v58, %v844_v60 }
 0x824   : > { %v846_v62 = vsel %vm2081_vm5, %v845_v61, -1e+30  ;;  %v1334_v61 = vld [vmem:[#allocation9 + $0x30] ss:$0 sm:$0xff] }
 0x825   : > { %v847_v63 = vsel %vm509_vm7, %v846_v62, -inf }
 0x826   : > { %848 = vmax.xlane.f32.xlu1 %v847_v63 }
 0x8b3   : > { %v849_v1 = vpop.xlane.xlu1 %848 }
 0x8b4   : > { %v850_v2 = vsub.f32 %v846_v62, %v849_v1 }
 0x8b6   : > { %v851_v3 = vmul.f32 1.442695, %v850_v2 }
 0x8b8   : > { %1574 = vpow2.f32 %v851_v3 }
 0x8c2   : > { %v1575_v4 = vpop.eup %1574 }
 0x8c3   : > { %v853_v5 = vsel %vm509_vm7, %v1575_v4, 0.0 }
 0x8c4   : > { %854 = vadd.xlane.f32.xlu1 %v853_v5 }
 0x951   : > { %v855_v6 = vpop.xlane.xlu1 %854 }
 0x952   : > { %v856_v7 = vmax.f32 %v855_v6, 1e-30 }
 0x954   : > { %1576 = vrcp.f32 %v856_v7 }
 0x95e   : > { %v1577_v8 = vpop.eup %1576 }
 0x95f   : > { %v858_v9 = vmul.f32 %v1577_v8, %v1575_v4 }
 0x961   : > { %v859_v10 = vpack.c.bf16 %v858_v9, %v858_v9 }
 0x963   : > { %1443 = vmatmul.mubr.msk.bf16.vlgmr.msra.gmra.mrb[12].mxu0 %vm509_vm7, %v859_v10 }
 0x964   : > { %1454 = vmatprep.mubr.msk.bf16.mxu0 %vm1783_vm0, %v1782_v0  ;;  %1453 = vmatpush3.bf16.msra.mxu0 %v1564_v32 }
 0x965   : > { %1464 = vmatprep.subr.bf16.mxu0 %v1782_v0 }
 0xa36   : > { %v904_v12 = vpop.f32.mrb[12].mxu0 }
 0xa37   : > { %v905_v14 = vadd.f32 %v1328_v11, %v904_v12  ;;  %v1444_v15 = vpop.f32.mrb[13].mxu0 }
 0xa38   : > { %v907_v16 = vpop.f32.mrb[14].mxu0 }
 0xa39   : > { %v910_v18 = vpack.c.bf16 %v905_v14, %v905_v14  ;;  %v1034_v20 = vsel %vm445_vm3, %v905_v14, 0.0  ;;  %v1445_v21 = vpop.f32.mrb[15].mxu0  ;;  %v916_v22 = vmul.f32 %v1330_v13, %v905_v14 }
 0xa3a   : > { %v1035_v23 = vrot.slane %v1034_v20, 4 }
 0xa3b   : > { %1449 = vmatmul.mubr.msk.bf16.vlgmr.msra.gmra.mrb[20].mxu1 %vm445_vm3, %v910_v18  ;;  %v917_v24 = vsel %vm445_vm3, %v916_v22, 0.0 }
 0xa3c   : > { %v1036_v25 = vadd.f32 %v1035_v23, %v1034_v20  ;;  %918 = vadd.xlane.f32.xlu1 %v917_v24  ;;  %1459 = vmatpush3.bf16.msra.mxu1 %v1563_v17 }
 0xa3d   : > { %1460 = vmatprep.mubr.msk.bf16.mxu1 %vm1783_vm0, %v1782_v0 }
 0xa3e   : > { %v1037_v26 = vrot.slane %v1036_v25, 2 }
 0xa40   : > { %v1038_v27 = vadd.f32 %v1037_v26, %v1036_v25 }
 0xa42   : > { %v1039_v28 = vrot.slane %v1038_v27, 1 }
 0xa44   : > { %v1040_v29 = vadd.f32 %v1039_v28, %v1038_v27 }
 0xa46   : > { %v1042_v30 = vmul.f32 0.125, %v1040_v29 }
 0xa48   : > { %v1043_v31 = vpack.c.bf16 %v1042_v30, %v1042_v30 }
 0xa4a   : > { %1461 = vmatmul.mubr.msk.bf16.vlgmr.msra.gmra.mrb[24].mxu1 %vm445_vm3, %v1043_v31 }
 0xac9   : > { %v919_v62 = vpop.xlane.xlu1 %918 }
 0xb0e   : > { %v970_v34 = vpop.f32.mrb[20].mxu1 }
 0xb0f   : > { %v971_v35 = vadd.f32 %v1331_v33, %v970_v34  ;;  %v1450_v36 = vpop.f32.mrb[21].mxu1 }
 0xb10   : > { %v973_v37 = vpop.f32.mrb[22].mxu1 }
 0xb11   : > { %v976_v38 = vmax.f32 %v971_v35, 0.0  ;;  %v1451_v39 = vpop.f32.mrb[23].mxu1 }
 0xb13   : > { %v977_v41 = vpack.c.bf16 %v976_v38, %v976_v38 }
 0xb15   : > { %1455 = vmatmul.mubr.msk.bf16.vlgmr.msra.gmra.mrb[16].mxu0 %vm445_vm3, %v977_v41 }
 0xb16   : > { %1465 = vmatpush3.bf16.msra.mxu0 %v1565_v40  ;;  %1466 = vmatprep.mubr.msk.bf16.mxu0 %vm1783_vm0, %v1782_v0 }
 0xb1d   : > { %v1090_v43 = vpop.f32.mrb[24].mxu1 }
 0xb1e   : > { %v1091_v44 = vadd.f32 %v1090_v43, %v1046_v42  ;;  %v1462_v45 = vpop.f32.mrb[25].mxu1 }
 0xb1f   : > { %v1093_v46 = vpop.f32.mrb[26].mxu1 }
 0xb20   : > { %v1096_v47 = vmax.f32 %v1091_v44, 0.0  ;;  %v1463_v48 = vpop.f32.mrb[27].mxu1 }
 0xb22   : > { %v1097_v49 = vpack.c.bf16 %v1096_v47, %v1096_v47 }
 0xb24   : > { %1467 = vmatmul.mubr.msk.bf16.vlgmr.msra.gmra.mrb[20].mxu0 %vm445_vm3, %v1097_v49 }
 0xbe8   : > { %v1028_v50 = vpop.f32.mrb[16].mxu0 }
 0xbe9   : > { %v1456_v51 = vpop.f32.mrb[17].mxu0  ;;  %v1029_v63 = vadd.f32 %v1334_v61, %v1028_v50 }
 0xbea   : > { %v1031_v53 = vpop.f32.mrb[18].mxu0 }
 0xbeb   : > { %v1457_v54 = vpop.f32.mrb[19].mxu0  ;;  %v1159_v1 = vsel %vm1158_vm11, %v1029_v63, %v919_v62 }
 0xbf7   : > { %v1144_v56 = vpop.f32.mrb[20].mxu0 }
 0xbf8   : > { %v1145_v57 = vadd.f32 %v1144_v56, %v1100_v55  ;;  %v1468_v0 = vpop.f32.mrb[21].mxu0 }
 0xbf9   : > { %v1147_v58 = vpop.f32.mrb[22].mxu0 }
 0xbfa   : > { %v1153_v59 = vrot.slane %v1145_v57, %v2058_v19  ;;  %v1469_v60 = vpop.f32.mrb[23].mxu0 }
 0xbfc   : > { %1155 = vrot.lane.b32.xlu1 %v1153_v59, %s1786_s29 }
 0xc6e   : > { %v1156_v2 = vpop.permute.xlu1 %1155 }
 0xc6f   : > { %v1161_v3 = vsel %vm1160_vm12, %v1159_v1, %v1156_v2 }
 0xc70   : > { %v1163_v19 = vsel %vm1162_vm13, %v1161_v3, 0.0 }
 0xc71   : > { %1164 = vst [vmem:[%s278_s8] sm:$0xff] %v1163_v19 }
 0xc72   : > { %1707 = shalt.err (!%p1704_p5)
}
 0xc73   : > { %s1708_s12 = scalar_lea.hbm %s2144_s6, 128  ;;  %s1712_s9 = scalar_lea.hbm %s2192_s4, 256 }
 0xc74   : > { %p1709_p1 = scmp.ne.s32.totalorder %s2144_s6, %s1708_s12  ;;  %p1713_p0 = scmp.lt.u32.totalorder %s2144_s6, %s2192_s4 }
 0xc75   : > { %p1714_p9 = scmp.lt.u32.totalorder %s1712_s9, %s1708_s12  ;;  %p1716_p2 = scmp.lt.u32.totalorder %s1708_s12, %s2144_s6 }
 0xc76   : > { %p1710_p8 = pnand %p1709_p1, %p2214_p13 }
 0xc77   : > { %p1715_p12 = por %p1714_p9, %p1713_p0 }
 0xc78   : > { %p1711_p11 = pneg %p1710_p8 }
 0xc79   : > { %p1717_p6 = por %p1716_p2, %p1715_p12 }
 0xc7b   : > { %p1718_p10 = pnand %p1717_p6, %p1711_p11 }
 0xc7d   : > { %1721 = shalt.err (!%p1718_p10)
}
 0xc7e   : > { %1482 = dma.vmem_to_hbm [thread:$0]  (%p2214_p13), %s2146_s2, 128, %s2144_s6, %s1166_s10  }
 0xc7f PF: > { %s1191_s29 = sand.u32 1, %s1760_s15   ;;  %p2215_p4 = scmp.ne.s32.totalorder %s2199_s22, 0 }
 0xc80   : > { %p2216_p7 = scmp.ge.s32.totalorder %s1772_s18, 2  ;;  %s1192_s26 = scalar_lea.sflag [#allocation5], %s1191_s29 }
 0xc82   : > { %p1499_p3 = pnand %p2216_p7, %p2215_p4 }
 0xc84   : > { %1755 = dma.done.wait (!%p1499_p3), %s1192_s26, 128  }
 0xc85   : > { %1757 = vsyncadd (!%p1499_p3), %s1192_s26, 4294967168  ;;  %p21_p5 = scmp.ge.s32.totalorder %s1923_s11, 4   ;;  %s2217_s15 = smov %s1764_s16 }
 0xc86   : > { %s2218_s16 = smov %s1768_s17  ;;  %s2219_s17 = smov %s1932_s14 }
 0xc87   : > { %s2220_s18 = smov %s1923_s11  ;;  %23 = sbr.rel (!%p21_p5) target bundleno = 10 (0xa), region = 102 }
 0xc8e   :  { %1197 = vsyncpa [#allocation4], 1 }
 0xc8f   :  { %1199 = vsyncpa [#allocation4 + $0x1], 1 }
 0xc90   :  { %1200 = vsyncpa [#allocation7], 1 }
 0xc91   :  { %1202 = vsyncpa [#allocation7 + $0x1], 1 }
 0xc92   :  { %1203 = vsyncpa [#allocation10], 1 }
 0xc93   :  { %1204 = vsyncpa [#allocation5], 1 }
 0xc94   :  { %1206 = vsyncpa [#allocation5 + $0x1], 1 }

</bundles_post_ra>
